<compile_context>
chip_gen: v6e
topology: v6e:2x2x1
jax: 0.10.0
libtpu: 0.0.40
codegen_flags: <defaults>
</compile_context>

<pallas_src>
from functools import partial

import numpy as np
import jax
import jax.numpy as jnp
from jax.experimental import pallas as pl
from jax.experimental.pallas import tpu as pltpu


def _round_up(x, m):
    return ((x + m - 1) // m) * m


def _cdiv(a, b):
    return -(-a // b)


# ---------------------------------------------------------------------------
# Kernel A: F-chunked embedding matmuls + score / loss / decision (packed stats)
# ---------------------------------------------------------------------------
def emb_stats_kernel(x1_ref, x2_ref, w_ref, emb1_ref, stats_ref,
                     acc1_ref, acc2_ref, *, inv_d, threshold):
    # x1_ref, x2_ref: (TILE_N, F_CHUNK)  compute dtype
    # w_ref:          (F_CHUNK, D_PAD)   compute dtype
    # emb1_ref:       (TILE_N, D_PAD)    compute dtype (already scaled by -1/D)
    # stats_ref:      (TILE_N, 128) f32  col0=score col1=loss col2=decision
    # acc1/acc2:      (TILE_N, D_PAD) f32 VMEM accumulators (persist across F chunks)
    k = pl.program_id(1)

    @pl.when(k == 0)
    def _():
        acc1_ref[...] = jnp.zeros_like(acc1_ref)
        acc2_ref[...] = jnp.zeros_like(acc2_ref)

    w = w_ref[...]
    acc1_ref[...] += jnp.dot(x1_ref[...], w, preferred_element_type=jnp.float32)
    acc2_ref[...] += jnp.dot(x2_ref[...], w, preferred_element_type=jnp.float32)

    @pl.when(k == pl.num_programs(1) - 1)
    def _():
        emb1 = acc1_ref[...]
        emb2 = acc2_ref[...]
        score = jnp.sum(emb1 * emb2, axis=-1, keepdims=True) * inv_d   # (TILE_N, 1) f32
        loss_v = threshold - score
        dec = (score >= threshold).astype(jnp.float32)

        # Lane-dense packed scalar output; zero-fill then three narrow VMEM column stores.
        stats_ref[...] = jnp.zeros_like(stats_ref)
        stats_ref[:, 0:1] = score
        stats_ref[:, 1:2] = loss_v
        stats_ref[:, 2:3] = dec

        # Fold -1/D into the small (TILE_N, D) operand of the grad matmul.
        emb1_ref[...] = (emb1 * (-inv_d)).astype(emb1_ref.dtype)


# ---------------------------------------------------------------------------
# Kernel B: grad = (-1/D * emb1) @ W^T, tiled over (rows, F chunks) -- pure matmul
# ---------------------------------------------------------------------------
def grad_kernel(emb1_ref, wt_ref, grad_ref):
    grad_ref[...] = jnp.dot(emb1_ref[...], wt_ref[...],
                            preferred_element_type=jnp.float32).astype(grad_ref.dtype)


# ---------------------------------------------------------------------------
# Tiling / budget helpers
# ---------------------------------------------------------------------------
def _vmem_budgets():
    """Generation-aware VMEM budget (v5e/v6e: 128 MiB physical, v7x: 64 MiB)."""
    try:
        cap = int(pltpu.get_tpu_info().vmem_capacity_bytes)
    except Exception:
        cap = 64 * 1024 * 1024
    vmem_limit = (cap * 3) // 4          # ~48 MiB on v7x, ~96 MiB on v5e/v6e
    tile_budget = (vmem_limit * 85) // 100   # headroom for Mosaic internal scratch
    return int(vmem_limit), int(tile_budget)


def _choose_tiles(n, f_pad, d_pad, in_isz, grad_isz, tile_budget):
    """Pick (tile_n, n_pad, f_chunk, f_pad) so double-buffered blocks fit the budget."""
    # Divisor-aware F chunking (<128 padded columns per chunk).
    n_chunks = _cdiv(f_pad, 4096)
    f_chunk = _round_up(_cdiv(f_pad, n_chunks), 128)
    f_pad = n_chunks * f_chunk

    # Per-row VMEM (double-buffered pipeline buffers + f32 accumulators), both kernels.
    per_row_a = 2 * 2 * f_chunk * in_isz + 2 * (d_pad * in_isz + 128 * 4) + 2 * d_pad * 4
    per_row_b = 2 * (d_pad * in_isz + f_chunk * grad_isz)
    per_row = max(per_row_a, per_row_b)
    fixed = 2 * f_chunk * d_pad * in_isz          # weight chunk, double-buffered

    rows = max(8, (tile_budget - fixed) // per_row)
    tile_max = max(8, min(1024, (rows // 8) * 8))

    # Divisor-aware tile_n: <8 padded rows per grid step.
    g = _cdiv(max(n, 1), tile_max)
    tile_n = _round_up(_cdiv(max(n, 1), g), 8)
    # Ensure >= 2 steps on the parallel row axis (v7x dual TensorCore) when possible.
    if g < 2 and tile_n > 8:
        tile_n = _round_up(_cdiv(tile_n, 2), 8)
    g = _cdiv(max(n, 1), tile_n)
    n_pad = g * tile_n
    return int(tile_n), int(n_pad), int(f_chunk), int(f_pad)


# ---------------------------------------------------------------------------
# Forward: synthetic make_decision_SV + loss + d loss/d x2 on (N, F) inputs
# ---------------------------------------------------------------------------
@partial(jax.jit, static_argnames=("threshold", "compute_dtype", "grad_dtype"))
def sv_forward_pallas(x1_flat, x2_flat, w, *, threshold,
                      compute_dtype=jnp.bfloat16, grad_dtype=jnp.float32):
    n, f = x1_flat.shape
    d = w.shape[1]

    in_isz = jnp.dtype(compute_dtype).itemsize
    grad_isz = jnp.dtype(grad_dtype).itemsize
    d_pad = _round_up(d, 128)
    f_pad0 = _round_up(f, 128)

    vmem_limit, tile_budget = _vmem_budgets()
    tile_n, n_pad, f_chunk, f_pad = _choose_tiles(n, f_pad0, d_pad, in_isz, grad_isz,
                                                  tile_budget)
    n_tiles = n_pad // tile_n
    k_chunks = f_pad // f_chunk

    # Separate pad-only passes for x1 / x2 (no stack => no extra HBM round trip);
    # cast to the compute dtype once here.  Zero padding is exact for this model.
    x1p = jnp.zeros((n_pad, f_pad), compute_dtype).at[:n, :f].set(x1_flat.astype(compute_dtype))
    x2p = jnp.zeros((n_pad, f_pad), compute_dtype).at[:n, :f].set(x2_flat.astype(compute_dtype))
    wp = jnp.zeros((f_pad, d_pad), compute_dtype).at[:f, :d].set(w.astype(compute_dtype))
    wtp = wp.T                                  # transpose once, outside the kernels

    inv_d = 1.0 / d
    kernel_a = partial(emb_stats_kernel, inv_d=inv_d, threshold=float(threshold))

    emb1s, stats = pl.pallas_call(
        kernel_a,
        out_shape=(jax.ShapeDtypeStruct((n_pad, d_pad), compute_dtype),
                   jax.ShapeDtypeStruct((n_pad, 128), jnp.float32)),
        grid_spec=pltpu.PrefetchScalarGridSpec(
            num_scalar_prefetch=0,
            grid=(n_tiles, k_chunks),
            in_specs=[
                pl.BlockSpec((tile_n, f_chunk), lambda i, k: (i, k)),   # x1 chunk
                pl.BlockSpec((tile_n, f_chunk), lambda i, k: (i, k)),   # x2 chunk
                pl.BlockSpec((f_chunk, d_pad), lambda i, k: (k, 0)),    # W chunk
            ],
            out_specs=[
                pl.BlockSpec((tile_n, d_pad), lambda i, k: (i, 0)),     # -emb1/D
                pl.BlockSpec((tile_n, 128), lambda i, k: (i, 0)),       # packed stats
            ],
            scratch_shapes=[pltpu.VMEM((tile_n, d_pad), jnp.float32),
                            pltpu.VMEM((tile_n, d_pad), jnp.float32)]),
        compiler_params=pltpu.CompilerParams(
            dimension_semantics=("parallel", "arbitrary"),
            vmem_limit_bytes=vmem_limit),
        cost_estimate=pl.CostEstimate(
            flops=int(4 * n_pad * f_pad * d_pad),
            transcendentals=0,
            bytes_accessed=int(in_isz * (2 * n_pad * f_pad + n_tiles * f_pad * d_pad)
                               + in_isz * n_pad * d_pad + 4 * n_pad * 128)),
    )(x1p, x2p, wp)

    grad = pl.pallas_call(
        grad_kernel,
        out_shape=jax.ShapeDtypeStruct((n_pad, f_pad), grad_dtype),
        grid=(n_tiles, k_chunks),
        in_specs=[
            pl.BlockSpec((tile_n, d_pad), lambda i, k: (i, 0)),         # -emb1/D tile
            pl.BlockSpec((d_pad, f_chunk), lambda i, k: (0, k)),        # W^T chunk
        ],
        out_specs=pl.BlockSpec((tile_n, f_chunk), lambda i, k: (i, k)),
        compiler_params=pltpu.CompilerParams(
            dimension_semantics=("parallel", "parallel"),
            vmem_limit_bytes=vmem_limit),
        cost_estimate=pl.CostEstimate(
            flops=int(2 * n_pad * d_pad * f_pad),
            transcendentals=0,
            bytes_accessed=int(in_isz * (n_tiles * d_pad * f_pad + k_chunks * n_pad * d_pad)
                               + grad_isz * n_pad * f_pad)),
    )(emb1s, wtp)

    score = stats[:n, 0:1]                          # (N, 1)  (matches torch.unsqueeze(..., 1))
    loss = stats[:n, 1]                             # (N,)
    dec = (stats[:n, 2] > 0.5).astype(jnp.int32)    # (N,)
    grad = grad[:n, :f].astype(jnp.float32)         # (N, F)
    return score, loss, grad, dec


# ---------------------------------------------------------------------------
# EOTSV.forward equivalent
# ---------------------------------------------------------------------------
def eot_sv_ensemble_forward(x1_batch, x2_batch, y_batch, w, threshold,
                            EOT_num_batches=1, EOT_batch_size=1, use_grad=True,
                            compute_dtype=jnp.bfloat16, grad_dtype=jnp.float32):
    """Mirrors EOTSV.forward.

    The synthetic SV model is deterministic, so every EOT replica in every EOT batch
    produces identical scores / losses / grads / decisions.  The original module's
    repeat -> mean over EOT_batch_size -> accumulate over EOT_num_batches therefore
    collapses exactly to one launch over the unique audios followed by a scale, and
    the per-replica decisions are replicas of the per-audio decision.  One host sync,
    after all device work has been issued.
    """
    n_audios, n_channels, max_len = x2_batch.shape
    f = n_channels * max_len
    del y_batch  # unused by the synthetic SV model (as in the original module's loss path)

    sc, ls, gr, dec = sv_forward_pallas(
        x1_batch.reshape(n_audios, f), x2_batch.reshape(n_audios, f), w,
        threshold=float(threshold), compute_dtype=compute_dtype, grad_dtype=grad_dtype)

    scale = float(EOT_num_batches)
    scores = scale * sc                                               # (n_audios, 1)
    loss = scale * ls                                                 # (n_audios,)
    grad = (scale * gr.reshape(n_audios, n_channels, max_len)) if use_grad else None

    dec_np = np.asarray(jax.device_get(dec)).astype(np.int64)
    n_rep = EOT_num_batches * EOT_batch_size
    decisions = [[int(dec_np[i])] * n_rep for i in range(n_audios)]
    return scores, loss, grad, decisions


if __name__ == "__main__":
    # Small, deterministic example shapes.
    n_audios, n_channels, max_len = 2, 1, 256
    emb_dim = 64
    threshold = 0.1
    EOT_size, EOT_batch_size = 2, 1
    EOT_num_batches = EOT_size // EOT_batch_size

    key = jax.random.PRNGKey(0)
    k1, k2, kw = jax.random.split(key, 3)
    x1_batch = jax.random.normal(k1, (n_audios, n_channels, max_len), dtype=jnp.float32)
    x2_batch = jax.random.normal(k2, (n_audios, n_channels, max_len), dtype=jnp.float32)
    y_batch = jnp.zeros((n_audios,), dtype=jnp.int32)

    F = n_channels * max_len
    w = jax.random.normal(kw, (F, emb_dim), dtype=jnp.float32) / jnp.sqrt(float(F))

    # Default path (bf16 matmuls, f32 accumulation / stats / grad).
    scores, loss, grad, decisions = eot_sv_ensemble_forward(
        x1_batch, x2_batch, y_batch, w, threshold,
        EOT_num_batches=EOT_num_batches, EOT_batch_size=EOT_batch_size, use_grad=True)
    jax.block_until_ready((scores, loss, grad))

    # Pure-JAX reference check (same math, no Pallas).
    x1f = x1_batch.reshape(n_audios, F)
    x2f = x2_batch.reshape(n_audios, F)
    e1 = x1f @ w
    e2 = x2f @ w
    sc_ref = (e1 * e2).sum(-1, keepdims=True) / emb_dim
    ls_ref = threshold - sc_ref[:, 0]
    gr_ref = (-(1.0 / emb_dim) * (e1 @ w.T)).reshape(n_audios, n_channels, max_len)

    # bf16 compute path: loose tolerance vs. the f32 reference.
    assert np.allclose(np.asarray(scores), EOT_num_batches * np.asarray(sc_ref),
                       rtol=2e-2, atol=2e-2)
    assert np.allclose(np.asarray(loss), EOT_num_batches * np.asarray(ls_ref),
                       rtol=2e-2, atol=2e-2)
    assert np.allclose(np.asarray(grad), EOT_num_batches * np.asarray(gr_ref),
                       rtol=2e-2, atol=2e-2)
    assert all(len(d) == EOT_num_batches * EOT_batch_size for d in decisions)

    # f32 compute path reproduces the reference tightly.
    sc32, ls32, gr32, _ = sv_forward_pallas(x1f, x2f, w, threshold=float(threshold),
                                            compute_dtype=jnp.float32)
    jax.block_until_ready((sc32, ls32, gr32))
    assert np.allclose(np.asarray(sc32), np.asarray(sc_ref), rtol=1e-4, atol=1e-4)
    assert np.allclose(np.asarray(ls32), np.asarray(ls_ref), rtol=1e-4, atol=1e-4)
    assert np.allclose(np.asarray(gr32).reshape(n_audios, n_channels, max_len),
                       np.asarray(gr_ref), rtol=1e-4, atol=1e-4)

    print("KERNEL_OK")
</pallas_src>

<mosaic_0001>
module attributes {stable_mosaic.version = 11 : i64} {
  func.func @emb_stats_kernel(%arg0: i32, %arg1: i32, %arg2: memref<8x256xbf16, #tpu.memory_space<vmem>>, %arg3: memref<8x256xbf16, #tpu.memory_space<vmem>>, %arg4: memref<256x128xbf16, #tpu.memory_space<vmem>>, %arg5: memref<8x128xbf16, #tpu.memory_space<vmem>>, %arg6: memref<8x128xf32, #tpu.memory_space<vmem>>, %arg7: memref<8x128xf32, #tpu.memory_space<vmem>>, %arg8: memref<8x128xf32, #tpu.memory_space<vmem>>) attributes {dimension_semantics = [#tpu.dimension_semantics<parallel>, #tpu.dimension_semantics<arbitrary>], iteration_bounds = array<i64: 1, 1>, scalar_prefetch = 0 : i64, scratch_operands = 2 : i64, tpu.core_type = #tpu.core_type<tc>, window_params = [{transform_indices = @transform_0, window_bounds = array<i64: 8, 256>}, {transform_indices = @transform_1, window_bounds = array<i64: 8, 256>}, {transform_indices = @transform_2, window_bounds = array<i64: 256, 128>}, {transform_indices = @transform_3, window_bounds = array<i64: 8, 128>}, {transform_indices = @transform_4, window_bounds = array<i64: 8, 128>}]} {
    %c0_i32 = arith.constant 0 : i32
    %0 = arith.cmpi eq, %arg1, %c0_i32 : i32
    %1 = arith.extui %0 : i1 to i32
    %c0_i32_0 = arith.constant 0 : i32
    %2 = arith.cmpi ne, %1, %c0_i32_0 : i32
    scf.if %2 {
      %cst_17 = arith.constant 0.000000e+00 : f32
      %17 = vector.broadcast %cst_17 : f32 to vector<8x128xf32>
      %c0_18 = arith.constant 0 : index
      %c0_19 = arith.constant 0 : index
      %18 = vector.load %arg7[%c0_18, %c0_19] : memref<8x128xf32, #tpu.memory_space<vmem>>, vector<8x128xf32>
      tpu.vector_store %arg7[%c0_18, %c0_19], %17 {strides = array<i32>} : memref<8x128xf32, #tpu.memory_space<vmem>>, vector<8x128xf32>,
      %cst_20 = arith.constant 0.000000e+00 : f32
      %19 = vector.broadcast %cst_20 : f32 to vector<8x128xf32>
      %c0_21 = arith.constant 0 : index
      %c0_22 = arith.constant 0 : index
      %20 = vector.load %arg8[%c0_21, %c0_22] : memref<8x128xf32, #tpu.memory_space<vmem>>, vector<8x128xf32>
      tpu.vector_store %arg8[%c0_21, %c0_22], %19 {strides = array<i32>} : memref<8x128xf32, #tpu.memory_space<vmem>>, vector<8x128xf32>,
    } else {
    }
    %c0 = arith.constant 0 : index
    %c0_1 = arith.constant 0 : index
    %3 = vector.load %arg4[%c0, %c0_1] : memref<256x128xbf16, #tpu.memory_space<vmem>>, vector<256x128xbf16>
    %c0_2 = arith.constant 0 : index
    %c0_3 = arith.constant 0 : index
    %4 = vector.load %arg7[%c0_2, %c0_3] : memref<8x128xf32, #tpu.memory_space<vmem>>, vector<8x128xf32>
    %c0_4 = arith.constant 0 : index
    %c0_5 = arith.constant 0 : index
    %5 = vector.load %arg2[%c0_4, %c0_5] : memref<8x256xbf16, #tpu.memory_space<vmem>>, vector<8x256xbf16>
    %cst = arith.constant dense<0.000000e+00> : vector<8x128xf32>
    %6 = tpu.matmul %5, %3, %cst {dimension_numbers = #tpu.dot_dimension_numbers<[1], [0], [0], [1], [0, 0, 1, 1], [], []>} : vector<8x256xbf16>, vector<256x128xbf16>, vector<8x128xf32> -> vector<8x128xf32>
    %7 = arith.addf %4, %6 : vector<8x128xf32>
    %c0_6 = arith.constant 0 : index
    %c0_7 = arith.constant 0 : index
    %8 = vector.load %arg7[%c0_6, %c0_7] : memref<8x128xf32, #tpu.memory_space<vmem>>, vector<8x128xf32>
    tpu.vector_store %arg7[%c0_6, %c0_7], %7 {strides = array<i32>} : memref<8x128xf32, #tpu.memory_space<vmem>>, vector<8x128xf32>,
    %c0_8 = arith.constant 0 : index
    %c0_9 = arith.constant 0 : index
    %9 = vector.load %arg8[%c0_8, %c0_9] : memref<8x128xf32, #tpu.memory_space<vmem>>, vector<8x128xf32>
    %c0_10 = arith.constant 0 : index
    %c0_11 = arith.constant 0 : index
    %10 = vector.load %arg3[%c0_10, %c0_11] : memref<8x256xbf16, #tpu.memory_space<vmem>>, vector<8x256xbf16>
    %cst_12 = arith.constant dense<0.000000e+00> : vector<8x128xf32>
    %11 = tpu.matmul %10, %3, %cst_12 {dimension_numbers = #tpu.dot_dimension_numbers<[1], [0], [0], [1], [0, 0, 1, 1], [], []>} : vector<8x256xbf16>, vector<256x128xbf16>, vector<8x128xf32> -> vector<8x128xf32>
    %12 = arith.addf %9, %11 : vector<8x128xf32>
    %c0_13 = arith.constant 0 : index
    %c0_14 = arith.constant 0 : index
    %13 = vector.load %arg8[%c0_13, %c0_14] : memref<8x128xf32, #tpu.memory_space<vmem>>, vector<8x128xf32>
    tpu.vector_store %arg8[%c0_13, %c0_14], %12 {strides = array<i32>} : memref<8x128xf32, #tpu.memory_space<vmem>>, vector<8x128xf32>,
    %c0_i32_15 = arith.constant 0 : i32
    %14 = arith.cmpi eq, %arg1, %c0_i32_15 : i32
    %15 = arith.extui %14 : i1 to i32
    %c0_i32_16 = arith.constant 0 : i32
    %16 = arith.cmpi ne, %15, %c0_i32_16 : i32
    scf.if %16 {
      %c0_17 = arith.constant 0 : index
      %c0_18 = arith.constant 0 : index
      %17 = vector.load %arg7[%c0_17, %c0_18] : memref<8x128xf32, #tpu.memory_space<vmem>>, vector<8x128xf32>
      %c0_19 = arith.constant 0 : index
      %c0_20 = arith.constant 0 : index
      %18 = vector.load %arg8[%c0_19, %c0_20] : memref<8x128xf32, #tpu.memory_space<vmem>>, vector<8x128xf32>
      %19 = arith.mulf %17, %18 : vector<8x128xf32>
      %cst_21 = arith.constant dense<0.000000e+00> : vector<8xf32>
      %20 = vector.multi_reduction <add>, %19, %cst_21 [1] : vector<8x128xf32> to vector<8xf32>
      %21 = vector.shape_cast %20 : vector<8xf32> to vector<8x1xf32>
      %cst_22 = arith.constant 1.562500e-02 : f32
      %22 = vector.broadcast %cst_22 : f32 to vector<8x1xf32>
      %23 = arith.mulf %21, %22 : vector<8x1xf32>
      %cst_23 = arith.constant 1.000000e-01 : f32
      %24 = vector.broadcast %cst_23 : f32 to vector<8x1xf32>
      %25 = arith.subf %24, %23 : vector<8x1xf32>
      %cst_24 = arith.constant 1.000000e-01 : f32
      %26 = vector.broadcast %cst_24 : f32 to vector<8x1xf32>
      %27 = arith.cmpf oge, %23, %26 : vector<8x1xf32>
      %28 = arith.extui %27 : vector<8x1xi1> to vector<8x1xi32>
      %29 = arith.sitofp %28 : vector<8x1xi32> to vector<8x1xf32>
      %cst_25 = arith.constant 0.000000e+00 : f32
      %30 = vector.broadcast %cst_25 : f32 to vector<8x128xf32>
      %c0_26 = arith.constant 0 : index
      %c0_27 = arith.constant 0 : index
      %31 = vector.load %arg6[%c0_26, %c0_27] : memref<8x128xf32, #tpu.memory_space<vmem>>, vector<8x128xf32>
      tpu.vector_store %arg6[%c0_26, %c0_27], %30 {strides = array<i32>} : memref<8x128xf32, #tpu.memory_space<vmem>>, vector<8x128xf32>,
      %c0_28 = arith.constant 0 : index
      %c0_29 = arith.constant 0 : index
      %32 = vector.load %arg6[%c0_28, %c0_29] : memref<8x128xf32, #tpu.memory_space<vmem>>, vector<8x1xf32>
      tpu.vector_store %arg6[%c0_28, %c0_29], %23 {strides = array<i32>} : memref<8x128xf32, #tpu.memory_space<vmem>>, vector<8x1xf32>,
      %c0_30 = arith.constant 0 : index
      %c1 = arith.constant 1 : index
      %33 = vector.load %arg6[%c0_30, %c1] : memref<8x128xf32, #tpu.memory_space<vmem>>, vector<8x1xf32>
      tpu.vector_store %arg6[%c0_30, %c1], %25 {strides = array<i32>} : memref<8x128xf32, #tpu.memory_space<vmem>>, vector<8x1xf32>,
      %c0_31 = arith.constant 0 : index
      %c2 = arith.constant 2 : index
      %34 = vector.load %arg6[%c0_31, %c2] : memref<8x128xf32, #tpu.memory_space<vmem>>, vector<8x1xf32>
      tpu.vector_store %arg6[%c0_31, %c2], %29 {strides = array<i32>} : memref<8x128xf32, #tpu.memory_space<vmem>>, vector<8x1xf32>,
      %cst_32 = arith.constant -1.562500e-02 : f32
      %35 = vector.broadcast %cst_32 : f32 to vector<8x128xf32>
      %36 = arith.mulf %17, %35 : vector<8x128xf32>
      %37 = arith.truncf %36 : vector<8x128xf32> to vector<8x128xbf16>
      %c0_33 = arith.constant 0 : index
      %c0_34 = arith.constant 0 : index
      %38 = vector.load %arg5[%c0_33, %c0_34] : memref<8x128xbf16, #tpu.memory_space<vmem>>, vector<8x128xbf16>
      tpu.vector_store %arg5[%c0_33, %c0_34], %37 {strides = array<i32>} : memref<8x128xbf16, #tpu.memory_space<vmem>>, vector<8x128xbf16>,
    } else {
    }
    return
  }
  func.func @transform_0(%arg0: i32, %arg1: i32) -> (i32, i32) {
    %c0_i32 = arith.constant 0 : i32
    return %arg0, %arg1 : i32, i32
  }
  func.func @transform_1(%arg0: i32, %arg1: i32) -> (i32, i32) {
    %c0_i32 = arith.constant 0 : i32
    return %arg0, %arg1 : i32, i32
  }
  func.func @transform_2(%arg0: i32, %arg1: i32) -> (i32, i32) {
    %c0_i32 = arith.constant 0 : i32
    %c0_i32_0 = arith.constant 0 : i32
    return %arg1, %c0_i32 : i32, i32
  }
  func.func @transform_3(%arg0: i32, %arg1: i32) -> (i32, i32) {
    %c0_i32 = arith.constant 0 : i32
    %c0_i32_0 = arith.constant 0 : i32
    return %arg0, %c0_i32 : i32, i32
  }
  func.func @transform_4(%arg0: i32, %arg1: i32) -> (i32, i32) {
    %c0_i32 = arith.constant 0 : i32
    %c0_i32_0 = arith.constant 0 : i32
    return %arg0, %c0_i32 : i32, i32
  }
}

module attributes {stable_mosaic.version = 11 : i64} {
  func.func @grad_kernel(%arg0: i32, %arg1: i32, %arg2: memref<8x128xbf16, #tpu.memory_space<vmem>>, %arg3: memref<128x256xbf16, #tpu.memory_space<vmem>>, %arg4: memref<8x256xf32, #tpu.memory_space<vmem>>) attributes {dimension_semantics = [#tpu.dimension_semantics<parallel>, #tpu.dimension_semantics<parallel>], iteration_bounds = array<i64: 1, 1>, scalar_prefetch = 0 : i64, scratch_operands = 0 : i64, tpu.core_type = #tpu.core_type<tc>, window_params = [{transform_indices = @transform_0, window_bounds = array<i64: 8, 128>}, {transform_indices = @transform_1, window_bounds = array<i64: 128, 256>}, {transform_indices = @transform_2, window_bounds = array<i64: 8, 256>}]} {
    %c0 = arith.constant 0 : index
    %c0_0 = arith.constant 0 : index
    %0 = vector.load %arg2[%c0, %c0_0] : memref<8x128xbf16, #tpu.memory_space<vmem>>, vector<8x128xbf16>
    %c0_1 = arith.constant 0 : index
    %c0_2 = arith.constant 0 : index
    %1 = vector.load %arg3[%c0_1, %c0_2] : memref<128x256xbf16, #tpu.memory_space<vmem>>, vector<128x256xbf16>
    %cst = arith.constant dense<0.000000e+00> : vector<8x256xf32>
    %2 = tpu.matmul %0, %1, %cst {dimension_numbers = #tpu.dot_dimension_numbers<[1], [0], [0], [1], [0, 0, 1, 1], [], []>} : vector<8x128xbf16>, vector<128x256xbf16>, vector<8x256xf32> -> vector<8x256xf32>
    %c0_3 = arith.constant 0 : index
    %c0_4 = arith.constant 0 : index
    %3 = vector.load %arg4[%c0_3, %c0_4] : memref<8x256xf32, #tpu.memory_space<vmem>>, vector<8x256xf32>
    tpu.vector_store %arg4[%c0_3, %c0_4], %2 {strides = array<i32>} : memref<8x256xf32, #tpu.memory_space<vmem>>, vector<8x256xf32>,
    return
  }
  func.func @transform_0(%arg0: i32, %arg1: i32) -> (i32, i32) {
    %c0_i32 = arith.constant 0 : i32
    %c0_i32_0 = arith.constant 0 : i32
    return %arg0, %c0_i32 : i32, i32
  }
  func.func @transform_1(%arg0: i32, %arg1: i32) -> (i32, i32) {
    %c0_i32 = arith.constant 0 : i32
    %c0_i32_0 = arith.constant 0 : i32
    return %c0_i32, %arg1 : i32, i32
  }
  func.func @transform_2(%arg0: i32, %arg1: i32) -> (i32, i32) {
    %c0_i32 = arith.constant 0 : i32
    return %arg0, %arg1 : i32, i32
  }
}

</mosaic_0001>

<bundles_post_ra>
// kernel: sv_forward_pallas.3
= control target key start
LH: loop header
LB: loop body
LE: loop exit
PB: predicated region body
PF: predicated region fallthrough
CT: control target
= control target key end

     0   :  { %v197_v1 = vmov 0   ;;  %s270_s1 = inlined_call_operand.vmem [shape: bf16[128,256], index: 1, kind: input, shape index: {}]   ;;  %s271_s0 = inlined_call_operand.vmem [shape: bf16[8,128], index: 0, kind: input, shape index: {}]   ;;  %s272_s2 = inlined_call_operand.vmem [shape: f32[8,256], index: 2, kind: output, shape index: {}]  }
   0x1   :  { %v173_v0 = vld [vmem:[%s270_s1 + $0x74] ss:$8 sps:$4 sm:$0xff]   ;;  %141 = vmatprep.mubr.bf16.mxu0 %v197_v1  ;;  %v175_v2 = vld [vmem:[%s270_s1 + $0x70] ss:$8 sps:$4 sm:$0xff]   ;;  %v176_v3 = vld [vmem:[%s270_s1 + $0x64] ss:$8 sps:$4 sm:$0xff]  }
   0x2   :  { %109 = vmatprep.subr.bf16.mxu0 %v173_v0  ;;  %v178_v4 = vld [vmem:[%s270_s1 + $0x60] ss:$8 sps:$4 sm:$0xff]   ;;  %v179_v5 = vld [vmem:[%s270_s1 + $0x54] ss:$8 sps:$4 sm:$0xff]   ;;  %v181_v6 = vld [vmem:[%s270_s1 + $0x50] ss:$8 sps:$4 sm:$0xff]  }
   0x3   :  { %110 = vmatpush1.bf16.msra.mxu0 %v175_v2  ;;  %v182_v7 = vld [vmem:[%s270_s1 + $0x44] ss:$8 sps:$4 sm:$0xff]   ;;  %v184_v8 = vld [vmem:[%s270_s1 + $0x40] ss:$8 sps:$4 sm:$0xff]   ;;  %v185_v9 = vld [vmem:[%s270_s1 + $0x34] ss:$8 sps:$4 sm:$0xff]  }
   0x4   :  { %111 = vmatprep.subr.bf16.mxu0 %v176_v3  ;;  %v187_v10 = vld [vmem:[%s270_s1 + $0x30] ss:$8 sps:$4 sm:$0xff]   ;;  %v188_v11 = vld [vmem:[%s270_s1 + $0x24] ss:$8 sps:$4 sm:$0xff]   ;;  %v190_v12 = vld [vmem:[%s270_s1 + $0x20] ss:$8 sps:$4 sm:$0xff]  }
   0x5   :  { %v191_v13 = vld [vmem:[%s270_s1 + $0x14] ss:$8 sps:$4 sm:$0xff]   ;;  %v193_v14 = vld [vmem:[%s270_s1 + $0x10] ss:$8 sps:$4 sm:$0xff]   ;;  %v194_v15 = vld [vmem:[%s270_s1 + $0x4] ss:$8 sps:$4 sm:$0xff]  }
   0x6   :  { %v196_v16 = vld [vmem:[%s270_s1] ss:$8 sps:$4 sm:$0xff]  }
   0x7   :  { %112 = vmatpush1.bf16.msra.mxu0 %v178_v4  ;;  %v12_v17 = vld [vmem:[%s271_s0] sm:$0xf] }
   0x8   :  { %113 = vmatprep.subr.bf16.mxu0 %v179_v5 }
   0xb   :  { %114 = vmatpush1.bf16.msra.mxu0 %v181_v6 }
   0xc   :  { %115 = vmatprep.subr.bf16.mxu0 %v182_v7 }
   0xf   :  { %116 = vmatpush1.bf16.msra.mxu0 %v184_v8 }
  0x10   :  { %117 = vmatprep.subr.bf16.mxu0 %v185_v9 }
  0x13   :  { %118 = vmatpush1.bf16.msra.mxu0 %v187_v10 }
  0x14   :  { %119 = vmatprep.subr.bf16.mxu0 %v188_v11 }
  0x17   :  { %120 = vmatpush1.bf16.msra.mxu0 %v190_v12 }
  0x18   :  { %121 = vmatprep.subr.bf16.mxu0 %v191_v13 }
  0x1b   :  { %122 = vmatpush1.bf16.msra.mxu0 %v193_v14 }
  0x1c   :  { %123 = vmatprep.subr.bf16.mxu0 %v194_v15 }
  0x1f   :  { %124 = vmatpush1.bf16.msra.mxu0 %v196_v16 }
  0x22   :  { %142 = vmatmul.mubr.bf16.vlgmr.msra.gmra.mxu0 %v12_v17 }
  0xe2   :  { %v143_v18 = vpop.f32.mrf.mxu0 }
  0xe3   :  { %150 = vst [vmem:[%s272_s2] sm:$0xff] %v143_v18 }
  0xe4   :  { %v145_v19 = vpop.f32.mrf.mxu0 }
  0xe5   :  { %151 = vst [vmem:[%s272_s2 + $0x8] sm:$0xff] %v145_v19 }
  0xe6   :  { %v147_v20 = vpop.f32.mrf.mxu0 }
  0xe8   :  { %v148_v21 = vpop.f32.mrf.mxu0 }

// kernel: sv_forward_pallas.2
= control target key start
LH: loop header
LB: loop body
LE: loop exit
PB: predicated region body
PF: predicated region fallthrough
CT: control target
= control target key end

     0   :  { %v370_v35 = vmov 0.0   ;;  %vm267_vm0 = vcmask 7168   ;;  %vm269_vm1 = vcmask 15368   ;;  %vm271_vm3 = vcmask 23568   ;;  %s465_s2 = inlined_call_operand.vmem [shape: bf16[256,128], index: 2, kind: input, shape index: {}]   ;;  %s466_s0 = inlined_call_operand.vmem [shape: bf16[8,256], index: 0, kind: input, shape index: {}]   ;;  %s467_s1 = inlined_call_operand.vmem [shape: bf16[8,256], index: 1, kind: input, shape index: {}]   ;;  %s468_s3 = inlined_call_operand.vmem [shape: bf16[8,128], index: 3, kind: output, shape index: {0}]   ;;  %s469_s4 = inlined_call_operand.vmem [shape: f32[8,128], index: 4, kind: output, shape index: {1}]  }
   0x1   :  { %v350_v0 = vld [vmem:[%s465_s2 + $0x78] sm:$0xff]   ;;  %v352_v2 = vld [vmem:[%s465_s2 + $0x70] sm:$0xff]   ;;  %v354_v4 = vld [vmem:[%s465_s2 + $0x68] sm:$0xff]   ;;  %266 = vst [vmem:[%s469_s4] sm:$0xff] %v370_v35 }
   0x2   :  { %v351_v1 = vld [vmem:[%s465_s2 + $0x38] sm:$0xff]   ;;  %305 = vmatprep.subr.bf16.mxu0 %v350_v0  ;;  %327 = vmatprep.subr.bf16.mxu1 %v350_v0  ;;  %v353_v3 = vld [vmem:[%s465_s2 + $0x30] sm:$0xff]   ;;  %v355_v5 = vld [vmem:[%s465_s2 + $0x28] sm:$0xff]  }
   0x3   :  { %306 = vmatpush3.bf16.msra.mxu0 %v351_v1  ;;  %328 = vmatpush3.bf16.msra.mxu1 %v351_v1  ;;  %v356_v6 = vld [vmem:[%s465_s2 + $0x60] sm:$0xff]   ;;  %v358_v8 = vld [vmem:[%s465_s2 + $0x58] sm:$0xff]   ;;  %v360_v10 = vld [vmem:[%s465_s2 + $0x50] sm:$0xff]  }
   0x4   :  { %307 = vmatprep.subr.bf16.mxu0 %v352_v2  ;;  %329 = vmatprep.subr.bf16.mxu1 %v352_v2  ;;  %v357_v7 = vld [vmem:[%s465_s2 + $0x20] sm:$0xff]   ;;  %v359_v9 = vld [vmem:[%s465_s2 + $0x18] sm:$0xff]   ;;  %v361_v15 = vld [vmem:[%s465_s2 + $0x10] sm:$0xff]  }
   0x5   :  { %v56_v11 = vld [vmem:[%s466_s0] sm:$0xff]  ;;  %v362_v16 = vld [vmem:[%s465_s2 + $0x48] sm:$0xff]  }
   0x6   :  { %v203_v12 = vld [vmem:[%s467_s1] sm:$0xff]  ;;  %v285_v13 = vcombine.high %v56_v11, %v56_v11  ;;  %v363_v17 = vld [vmem:[%s465_s2 + $0x8] sm:$0xff]   ;;  %v284_v20 = vcombine.low %v56_v11, %v56_v11 }
   0x7   :  { %308 = vmatpush3.bf16.msra.mxu0 %v353_v3  ;;  %330 = vmatpush3.bf16.msra.mxu1 %v353_v3  ;;  %v303_v14 = vcombine.high %v203_v12, %v203_v12  ;;  %v364_v18 = vld [vmem:[%s465_s2 + $0x40] sm:$0xff]   ;;  %v302_v21 = vcombine.low %v203_v12, %v203_v12 }
   0x8   :  { %309 = vmatprep.subr.bf16.mxu0 %v354_v4  ;;  %331 = vmatprep.subr.bf16.mxu1 %v354_v4  ;;  %v365_v19 = vld [vmem:[%s465_s2] sm:$0xff]  }
   0x9   :  { %192 = vmatprep.mubr.bf16.mxu0 %v285_v13  ;;  %243 = vmatprep.mubr.bf16.mxu1 %v303_v14 }
   0xb   :  { %310 = vmatpush3.bf16.msra.mxu0 %v355_v5  ;;  %332 = vmatpush3.bf16.msra.mxu1 %v355_v5 }
   0xc   :  { %311 = vmatprep.subr.bf16.mxu0 %v356_v6  ;;  %333 = vmatprep.subr.bf16.mxu1 %v356_v6 }
   0xf   :  { %312 = vmatpush3.bf16.msra.mxu0 %v357_v7  ;;  %334 = vmatpush3.bf16.msra.mxu1 %v357_v7 }
  0x10   :  { %313 = vmatprep.subr.bf16.mxu0 %v358_v8  ;;  %335 = vmatprep.subr.bf16.mxu1 %v358_v8 }
  0x13   :  { %314 = vmatpush3.bf16.msra.mxu0 %v359_v9  ;;  %336 = vmatpush3.bf16.msra.mxu1 %v359_v9 }
  0x14   :  { %315 = vmatprep.subr.bf16.mxu0 %v360_v10  ;;  %337 = vmatprep.subr.bf16.mxu1 %v360_v10 }
  0x17   :  { %316 = vmatpush3.bf16.msra.mxu0 %v361_v15  ;;  %338 = vmatpush3.bf16.msra.mxu1 %v361_v15 }
  0x18   :  { %317 = vmatprep.subr.bf16.mxu0 %v362_v16  ;;  %339 = vmatprep.subr.bf16.mxu1 %v362_v16 }
  0x1b   :  { %318 = vmatpush3.bf16.msra.mxu0 %v363_v17  ;;  %340 = vmatpush3.bf16.msra.mxu1 %v363_v17 }
  0x1c   :  { %319 = vmatprep.subr.bf16.mxu0 %v364_v18  ;;  %341 = vmatprep.subr.bf16.mxu1 %v364_v18 }
  0x1f   :  { %320 = vmatpush3.bf16.msra.mxu0 %v365_v19  ;;  %342 = vmatpush3.bf16.msra.mxu1 %v365_v19 }
  0x22   :  { %193 = vmatmul.mubr.bf16.vlgmr.msra.gmra.mxu0 %v284_v20  ;;  %244 = vmatmul.mubr.bf16.vlgmr.msra.gmra.mxu1 %v302_v21 }
  0xe2   :  { %v321_v22 = vpop.f32.mrf.mxu0  ;;  %v343_v23 = vpop.f32.mrf.mxu1 }
  0xe4   :  { %v322_v24 = vpop.f32.mrf.mxu0  ;;  %v344_v25 = vpop.f32.mrf.mxu1 }
  0xe5   :  { %v323_v26 = vadd.f32 %v322_v24, %v321_v22  ;;  %v345_v27 = vadd.f32 %v344_v25, %v343_v23 }
  0xe6   :  { %v324_v28 = vpop.f32.mrf.mxu0  ;;  %v346_v29 = vpop.f32.mrf.mxu1 }
  0xe7   :  { %v273_v30 = vmul.f32 -0.015625, %v323_v26  ;;  %v258_v31 = vmul.f32 %v345_v27, %v323_v26 }
  0xe8   :  { %v325_v32 = vpop.f32.mrf.mxu0  ;;  %v347_v33 = vpop.f32.mrf.mxu1 }
  0xe9   :  { %v274_v34 = vpack.c.bf16 %v273_v30, %v273_v30  ;;  %259 = vadd.xlane.f32.xlu0 %v258_v31 }
  0xeb   :  { %275 = vst [vmem:[%s468_s3] sm:$0xf] %v274_v34 }
 0x172   :  { %v260_v36 = vpop.xlane.xlu0 %259 }
 0x173   :  { %v261_v37 = vmul.f32 0.015625, %v260_v36 }
 0x175   :  { %v262_v38 = vsub.f32 0.1, %v261_v37  ;;  %vm263_vm2 = vcmp.ge.f32.partialorder %v261_v37, 0.1  ;;  %268 = vst.msk [vmem:[%s469_s4] sm:$0xff] %vm267_vm0, %v261_v37 }
 0x176   :  { %v304_v39 = vsel %vm263_vm2, 1.0, %v370_v35 }
 0x177   :  { %270 = vst.msk [vmem:[%s469_s4] sm:$0xff] %vm269_vm1, %v262_v38 }
 0x178   :  { %272 = vst.msk [vmem:[%s469_s4] sm:$0xff] %vm271_vm3, %v304_v39 }

</bundles_post_ra>
